<compile_context>
chip_gen: v7x
topology: tpu7x:2x2x1
jax: 0.10.0
libtpu: 0.0.40
codegen_flags: <defaults>
</compile_context>

<pallas_src>
import functools

import jax
import jax.numpy as jnp
from jax.experimental import pallas as pl
from jax.experimental.pallas import tpu as pltpu


def ffn_kernel(x_ref, w1_ref, b1_ref, w2_ref, params_ref, o_ref, acc_ref,
               *, inv_n, mm_precision):
    k = pl.program_id(1)

    @pl.when(k == 0)
    def _():
        acc_ref[...] = jnp.zeros_like(acc_ref)

    x = x_ref[...]                                              # (tm, d_in_p), native dtype -> MXU
    # Hidden chunk: relu(x @ W1^T[:, chunk] + b1[chunk]), f32 accumulation on the MXU.
    h = jnp.dot(x, w1_ref[...], preferred_element_type=jnp.float32,
                precision=mm_precision)                         # (tm, tk)
    h = jnp.maximum(h + b1_ref[...].astype(jnp.float32), 0.0)
    # Partial y contribution: h_chunk @ W2^T[chunk, :], accumulated in f32.
    acc_ref[...] += jnp.dot(h.astype(w2_ref.dtype), w2_ref[...],
                            preferred_element_type=jnp.float32,
                            precision=mm_precision)             # (tm, d_in_p)

    @pl.when(k == pl.num_programs(1) - 1)
    def _():
        params = params_ref[...].astype(jnp.float32)            # (3, d_in_p): b2, gamma, beta
        # TODO(synk): dropout omitted (identity in eval mode).
        z = acc_ref[...] + params[0:1, :] + x_ref[...].astype(jnp.float32)
        # Fused one-pass LayerNorm over the REAL d_in columns: padded columns of z are
        # exactly zero (zero-padded x, b2, and W2^T columns), so sum(z) and sum(z*z)
        # are unaffected; scale by 1/d_in_real.
        mean = jnp.sum(z, axis=-1, keepdims=True) * inv_n
        var = jnp.maximum(jnp.sum(z * z, axis=-1, keepdims=True) * inv_n - mean * mean, 0.0)
        zn = (z - mean) * jax.lax.rsqrt(var + 1e-5)
        o_ref[...] = (zn * params[1:2, :] + params[2:3, :]).astype(o_ref.dtype)


def positionwise_ffn(x, w1, b1, w2, b2, gamma, beta, *, tm=256, tk=512):
    """x: (B, L, d_in).  w1: (d_hid, d_in) conv weight, w2: (d_in, d_hid) conv weight."""
    B, L, d_in = x.shape
    d_hid = w1.shape[0]
    rows = B * L
    itemsize = x.dtype.itemsize

    # ---- padded feature dims -------------------------------------------------------------
    # Lane-dense output: pad d_in up to a multiple of 128 (unmasked full-lane stores).
    d_in_p = pl.cdiv(d_in, 128) * 128
    # Hidden-dim chunk: either the full d_hid (single reduction step) or a multiple of 128.
    if d_hid <= max(tk, 128):
        tk = d_hid
        d_hid_p = d_hid
    else:
        tk = max(128, (tk // 128) * 128)
        d_hid_p = pl.cdiv(d_hid, tk) * tk

    # ---- row tile ------------------------------------------------------------------------
    rows8 = ((rows + 7) // 8) * 8
    tm = max(8, ((tm + 7) // 8) * 8)
    tm = min(tm, rows8)
    if rows8 >= 16:
        # Guarantee >= 2 row tiles when possible so v7x's 2nd TensorCore gets work.
        tm = min(tm, max(8, ((rows8 // 2) // 8) * 8))

    # ---- VMEM budget (device-aware) --------------------------------------------------------
    try:
        vmem_cap = int(pltpu.get_tpu_info().vmem_capacity_bytes)   # 128 MiB v5e/v6e, 64 MiB v7x
    except Exception:
        vmem_cap = 64 << 20                                        # conservative default

    def footprint(tm_):
        io = 2 * 2 * tm_ * d_in_p * itemsize                 # double-buffered x / out tiles
        w = 2 * (d_in_p * tk + tk * d_in_p) * itemsize       # double-buffered W1^T / W2^T blocks
        small = 2 * (tk + 3 * d_in_p) * 4                    # b1 chunk + packed b2/gamma/beta
        acc = tm_ * d_in_p * 4                               # f32 accumulator scratch
        tmp = tm_ * tk * (4 + itemsize)                      # f32 h + its cast copy
        tmp += 3 * tm_ * d_in_p * 4                          # z / zn / epilogue temporaries
        return io + w + small + acc + tmp

    while footprint(tm) > int(0.8 * vmem_cap) and tm > 8:
        new_tm = max(8, ((tm // 2) // 8) * 8)
        if new_tm == tm:
            break
        tm = new_tm

    vmem_limit = int(min(max(footprint(tm) + (8 << 20), 32 << 20), int(0.85 * vmem_cap)))

    # ---- operand prep ----------------------------------------------------------------------
    rows_p = pl.cdiv(rows, tm) * tm
    x2 = x.reshape(rows, d_in)
    if rows_p != rows or d_in_p != d_in:
        x2 = jnp.pad(x2, ((0, rows_p - rows), (0, d_in_p - d_in)))

    w_dt = x.dtype   # match weight dtype to activation dtype (no mixed-dtype matmul)
    w1_t = jnp.pad(w1.T, ((0, d_in_p - d_in), (0, d_hid_p - d_hid))).astype(w_dt)   # (d_in_p, d_hid_p)
    w2_t = jnp.pad(w2.T, ((0, d_hid_p - d_hid), (0, d_in_p - d_in))).astype(w_dt)   # (d_hid_p, d_in_p)
    b1_r = jnp.pad(b1, (0, d_hid_p - d_hid)).astype(jnp.float32).reshape(1, d_hid_p)
    params = jnp.stack([jnp.pad(b2, (0, d_in_p - d_in)),
                        jnp.pad(gamma, (0, d_in_p - d_in)),
                        jnp.pad(beta, (0, d_in_p - d_in))], axis=0).astype(jnp.float32)

    # f32 inputs keep true-f32 matmul numerics (matches the PyTorch module); bf16 inputs use
    # the fast bf16 MXU path with f32 accumulation.
    mm_precision = (jax.lax.Precision.HIGHEST if x.dtype == jnp.float32
                    else jax.lax.Precision.DEFAULT)

    grid = (rows_p // tm, d_hid_p // tk)
    kernel = functools.partial(ffn_kernel, inv_n=1.0 / d_in, mm_precision=mm_precision)

    out = pl.pallas_call(
        kernel,
        out_shape=jax.ShapeDtypeStruct((rows_p, d_in_p), x.dtype),
        grid_spec=pltpu.PrefetchScalarGridSpec(
            num_scalar_prefetch=0,
            grid=grid,
            in_specs=[
                pl.BlockSpec((tm, d_in_p), lambda i, k: (i, 0)),     # x row tile (reused over k)
                pl.BlockSpec((d_in_p, tk), lambda i, k: (0, k)),     # W1^T hidden chunk
                pl.BlockSpec((1, tk), lambda i, k: (0, k)),          # b1 hidden chunk
                pl.BlockSpec((tk, d_in_p), lambda i, k: (k, 0)),     # W2^T hidden chunk
                pl.BlockSpec((3, d_in_p), lambda i, k: (0, 0)),      # b2 / gamma / beta
            ],
            out_specs=pl.BlockSpec((tm, d_in_p), lambda i, k: (i, 0)),
            scratch_shapes=[pltpu.VMEM((tm, d_in_p), jnp.float32)],  # y accumulator
        ),
        compiler_params=pltpu.CompilerParams(
            dimension_semantics=("parallel", "arbitrary"),
            vmem_limit_bytes=vmem_limit),
    )(x2, w1_t, b1_r, w2_t, params)

    return out[:rows, :d_in].reshape(B, L, d_in)


def reference(x, w1, b1, w2, b2, gamma, beta):
    """Pure-JAX reference mirroring the PyTorch forward (eval mode), true-f32 matmuls."""
    hp = jax.lax.Precision.HIGHEST
    h = jax.nn.relu(jnp.einsum("bld,hd->blh", x, w1, precision=hp) + b1)
    y = jnp.einsum("blh,dh->bld", h, w2, precision=hp) + b2
    z = y + x
    mean = jnp.mean(z, axis=-1, keepdims=True)
    var = jnp.mean((z - mean) ** 2, axis=-1, keepdims=True)
    return (z - mean) * jax.lax.rsqrt(var + 1e-5) * gamma + beta


if __name__ == "__main__":
    key = jax.random.PRNGKey(0)
    kx, k1, kb1, k2, kb2, k3, kb3, k4 = jax.random.split(key, 8)

    # ---- Test 1: single hidden chunk; exercises d_in 32->128 lane padding, row padding,
    #              and >= 2 row tiles.
    B, L, d_in, d_hid = 2, 9, 32, 64
    x = jax.random.normal(kx, (B, L, d_in), dtype=jnp.float32)
    # Conv1d(d_in, d_hid, 1).weight has shape (d_hid, d_in, 1) -> squeeze last dim.
    w1 = jax.random.normal(k1, (d_hid, d_in), dtype=jnp.float32) * 0.1
    b1 = jax.random.normal(kb1, (d_hid,), dtype=jnp.float32) * 0.1
    w2 = jax.random.normal(k2, (d_in, d_hid), dtype=jnp.float32) * 0.1
    b2 = jax.random.normal(kb2, (d_in,), dtype=jnp.float32) * 0.1
    gamma = jnp.ones((d_in,), dtype=jnp.float32)
    beta = jnp.zeros((d_in,), dtype=jnp.float32)

    ref = reference(x, w1, b1, w2, b2, gamma, beta)
    out = jax.block_until_ready(positionwise_ffn(x, w1, b1, w2, b2, gamma, beta))
    assert out.shape == (B, L, d_in)
    assert jnp.allclose(out, ref, atol=1e-4, rtol=1e-4), "mismatch vs reference (test 1)"

    # ---- Test 2: d_hid=320 with tk=128 -> multi-step hidden-dim reduction (accumulator
    #              init/finalize path) plus d_hid padding 320 -> 384.
    d_hid2 = 320
    w1b = jax.random.normal(k3, (d_hid2, d_in), dtype=jnp.float32) * 0.1
    b1b = jax.random.normal(kb3, (d_hid2,), dtype=jnp.float32) * 0.1
    w2b = jax.random.normal(k4, (d_in, d_hid2), dtype=jnp.float32) * 0.1
    ref2 = reference(x, w1b, b1b, w2b, b2, gamma, beta)
    out2 = jax.block_until_ready(positionwise_ffn(x, w1b, b1b, w2b, b2, gamma, beta, tk=128))
    assert jnp.allclose(out2, ref2, atol=1e-4, rtol=1e-4), "mismatch vs reference (test 2)"

    # ---- Test 3: bf16 activation/weight fast path (loose tolerance vs f32 reference).
    xb = x.astype(jnp.bfloat16)
    outb = jax.block_until_ready(positionwise_ffn(xb, w1, b1, w2, b2, gamma, beta))
    assert outb.dtype == jnp.bfloat16
    assert jnp.allclose(outb.astype(jnp.float32), ref, atol=0.1, rtol=0.1), \
        "mismatch vs reference (bf16 path)"

    print("KERNEL_OK")
</pallas_src>

<mosaic_0001>
module attributes {stable_mosaic.version = 11 : i64} {
  func.func @ffn_kernel(%arg0: i32, %arg1: i32, %arg2: memref<8x128xf32, #tpu.memory_space<vmem>>, %arg3: memref<128x64xf32, #tpu.memory_space<vmem>>, %arg4: memref<1x64xf32, #tpu.memory_space<vmem>>, %arg5: memref<64x128xf32, #tpu.memory_space<vmem>>, %arg6: memref<3x128xf32, #tpu.memory_space<vmem>>, %arg7: memref<8x128xf32, #tpu.memory_space<vmem>>, %arg8: memref<8x128xf32, #tpu.memory_space<vmem>>) attributes {dimension_semantics = [#tpu.dimension_semantics<parallel>, #tpu.dimension_semantics<arbitrary>], iteration_bounds = array<i64: 3, 1>, scalar_prefetch = 0 : i64, scratch_operands = 1 : i64, tpu.core_type = #tpu.core_type<tc>, window_params = [{transform_indices = @transform_0, window_bounds = array<i64: 8, 128>}, {transform_indices = @transform_1, window_bounds = array<i64: 128, 64>}, {transform_indices = @transform_2, window_bounds = array<i64: 1, 64>}, {transform_indices = @transform_3, window_bounds = array<i64: 64, 128>}, {pipeline_mode = #tpu.pipeline_mode<synchronous>, transform_indices = @transform_4, window_bounds = array<i64: 3, 128>}, {transform_indices = @transform_5, window_bounds = array<i64: 8, 128>}]} {
    %c0_i32 = arith.constant 0 : i32
    %0 = arith.cmpi eq, %arg1, %c0_i32 : i32
    %1 = arith.extui %0 : i1 to i32
    %c0_i32_0 = arith.constant 0 : i32
    %2 = arith.cmpi ne, %1, %c0_i32_0 : i32
    scf.if %2 {
      %cst_16 = arith.constant 0.000000e+00 : f32
      %19 = vector.broadcast %cst_16 : f32 to vector<8x128xf32>
      %c0_17 = arith.constant 0 : index
      %c0_18 = arith.constant 0 : index
      %20 = vector.load %arg8[%c0_17, %c0_18] : memref<8x128xf32, #tpu.memory_space<vmem>>, vector<8x128xf32>
      tpu.vector_store %arg8[%c0_17, %c0_18], %19 {strides = array<i32>} : memref<8x128xf32, #tpu.memory_space<vmem>>, vector<8x128xf32>,
    } else {
    }
    %c0 = arith.constant 0 : index
    %c0_1 = arith.constant 0 : index
    %3 = vector.load %arg2[%c0, %c0_1] : memref<8x128xf32, #tpu.memory_space<vmem>>, vector<8x128xf32>
    %c0_2 = arith.constant 0 : index
    %c0_3 = arith.constant 0 : index
    %4 = vector.load %arg3[%c0_2, %c0_3] : memref<128x64xf32, #tpu.memory_space<vmem>>, vector<128x64xf32>
    %cst = arith.constant dense<0.000000e+00> : vector<8x64xf32>
    %5 = tpu.matmul %3, %4, %cst {dimension_numbers = #tpu.dot_dimension_numbers<[1], [0], [0], [1], [0, 0, 1, 1], [], []>, precision = #tpu.contract_precision<fp32>} : vector<8x128xf32>, vector<128x64xf32>, vector<8x64xf32> -> vector<8x64xf32>
    %c0_4 = arith.constant 0 : index
    %c0_5 = arith.constant 0 : index
    %6 = vector.load %arg4[%c0_4, %c0_5] : memref<1x64xf32, #tpu.memory_space<vmem>>, vector<1x64xf32>
    %7 = vector.broadcast %6 : vector<1x64xf32> to vector<8x64xf32>
    %8 = arith.addf %5, %7 : vector<8x64xf32>
    %cst_6 = arith.constant 0.000000e+00 : f32
    %9 = vector.broadcast %cst_6 : f32 to vector<8x64xf32>
    %10 = arith.maximumf %8, %9 : vector<8x64xf32>
    %c0_7 = arith.constant 0 : index
    %c0_8 = arith.constant 0 : index
    %11 = vector.load %arg8[%c0_7, %c0_8] : memref<8x128xf32, #tpu.memory_space<vmem>>, vector<8x128xf32>
    %c0_9 = arith.constant 0 : index
    %c0_10 = arith.constant 0 : index
    %12 = vector.load %arg5[%c0_9, %c0_10] : memref<64x128xf32, #tpu.memory_space<vmem>>, vector<64x128xf32>
    %cst_11 = arith.constant dense<0.000000e+00> : vector<8x128xf32>
    %13 = tpu.matmul %10, %12, %cst_11 {dimension_numbers = #tpu.dot_dimension_numbers<[1], [0], [0], [1], [0, 0, 1, 1], [], []>, precision = #tpu.contract_precision<fp32>} : vector<8x64xf32>, vector<64x128xf32>, vector<8x128xf32> -> vector<8x128xf32>
    %14 = arith.addf %11, %13 : vector<8x128xf32>
    %c0_12 = arith.constant 0 : index
    %c0_13 = arith.constant 0 : index
    %15 = vector.load %arg8[%c0_12, %c0_13] : memref<8x128xf32, #tpu.memory_space<vmem>>, vector<8x128xf32>
    tpu.vector_store %arg8[%c0_12, %c0_13], %14 {strides = array<i32>} : memref<8x128xf32, #tpu.memory_space<vmem>>, vector<8x128xf32>,
    %c0_i32_14 = arith.constant 0 : i32
    %16 = arith.cmpi eq, %arg1, %c0_i32_14 : i32
    %17 = arith.extui %16 : i1 to i32
    %c0_i32_15 = arith.constant 0 : i32
    %18 = arith.cmpi ne, %17, %c0_i32_15 : i32
    scf.if %18 {
      %c0_16 = arith.constant 0 : index
      %c0_17 = arith.constant 0 : index
      %19 = vector.load %arg6[%c0_16, %c0_17] : memref<3x128xf32, #tpu.memory_space<vmem>>, vector<3x128xf32>
      %c0_18 = arith.constant 0 : index
      %c0_19 = arith.constant 0 : index
      %20 = vector.load %arg8[%c0_18, %c0_19] : memref<8x128xf32, #tpu.memory_space<vmem>>, vector<8x128xf32>
      %21 = vector.extract_strided_slice %19 {offsets = [0, 0], sizes = [1, 128], strides = [1, 1]} : vector<3x128xf32> to vector<1x128xf32>
      %22 = vector.broadcast %21 : vector<1x128xf32> to vector<8x128xf32>
      %23 = arith.addf %20, %22 : vector<8x128xf32>
      %c0_20 = arith.constant 0 : index
      %c0_21 = arith.constant 0 : index
      %24 = vector.load %arg2[%c0_20, %c0_21] : memref<8x128xf32, #tpu.memory_space<vmem>>, vector<8x128xf32>
      %25 = arith.addf %23, %24 : vector<8x128xf32>
      %cst_22 = arith.constant dense<0.000000e+00> : vector<8xf32>
      %26 = vector.multi_reduction <add>, %25, %cst_22 [1] : vector<8x128xf32> to vector<8xf32>
      %27 = vector.shape_cast %26 : vector<8xf32> to vector<8x1xf32>
      %cst_23 = arith.constant 3.125000e-02 : f32
      %28 = vector.broadcast %cst_23 : f32 to vector<8x1xf32>
      %29 = arith.mulf %27, %28 : vector<8x1xf32>
      %30 = arith.mulf %25, %25 : vector<8x128xf32>
      %cst_24 = arith.constant dense<0.000000e+00> : vector<8xf32>
      %31 = vector.multi_reduction <add>, %30, %cst_24 [1] : vector<8x128xf32> to vector<8xf32>
      %32 = vector.shape_cast %31 : vector<8xf32> to vector<8x1xf32>
      %cst_25 = arith.constant 3.125000e-02 : f32
      %33 = vector.broadcast %cst_25 : f32 to vector<8x1xf32>
      %34 = arith.mulf %32, %33 : vector<8x1xf32>
      %35 = arith.mulf %29, %29 : vector<8x1xf32>
      %36 = arith.subf %34, %35 : vector<8x1xf32>
      %cst_26 = arith.constant 0.000000e+00 : f32
      %37 = vector.broadcast %cst_26 : f32 to vector<8x1xf32>
      %38 = arith.maximumf %36, %37 : vector<8x1xf32>
      %39 = vector.broadcast %29 : vector<8x1xf32> to vector<8x128xf32>
      %40 = arith.subf %25, %39 : vector<8x128xf32>
      %cst_27 = arith.constant 9.99999974E-6 : f32
      %41 = vector.broadcast %cst_27 : f32 to vector<8x1xf32>
      %42 = arith.addf %38, %41 : vector<8x1xf32>
      %43 = math.rsqrt %42 : vector<8x1xf32>
      %44 = vector.broadcast %43 : vector<8x1xf32> to vector<8x128xf32>
      %45 = arith.mulf %40, %44 : vector<8x128xf32>
      %46 = vector.extract_strided_slice %19 {offsets = [1, 0], sizes = [1, 128], strides = [1, 1]} : vector<3x128xf32> to vector<1x128xf32>
      %47 = vector.broadcast %46 : vector<1x128xf32> to vector<8x128xf32>
      %48 = arith.mulf %45, %47 : vector<8x128xf32>
      %49 = vector.extract_strided_slice %19 {offsets = [2, 0], sizes = [1, 128], strides = [1, 1]} : vector<3x128xf32> to vector<1x128xf32>
      %50 = vector.broadcast %49 : vector<1x128xf32> to vector<8x128xf32>
      %51 = arith.addf %48, %50 : vector<8x128xf32>
      %c0_28 = arith.constant 0 : index
      %c0_29 = arith.constant 0 : index
      %52 = vector.load %arg7[%c0_28, %c0_29] : memref<8x128xf32, #tpu.memory_space<vmem>>, vector<8x128xf32>
      tpu.vector_store %arg7[%c0_28, %c0_29], %51 {strides = array<i32>} : memref<8x128xf32, #tpu.memory_space<vmem>>, vector<8x128xf32>,
    } else {
    }
    return
  }
  func.func @transform_0(%arg0: i32, %arg1: i32) -> (i32, i32) {
    %c0_i32 = arith.constant 0 : i32
    %c0_i32_0 = arith.constant 0 : i32
    return %arg0, %c0_i32 : i32, i32
  }
  func.func @transform_1(%arg0: i32, %arg1: i32) -> (i32, i32) {
    %c0_i32 = arith.constant 0 : i32
    %c0_i32_0 = arith.constant 0 : i32
    return %c0_i32, %arg1 : i32, i32
  }
  func.func @transform_2(%arg0: i32, %arg1: i32) -> (i32, i32) {
    %c0_i32 = arith.constant 0 : i32
    %c0_i32_0 = arith.constant 0 : i32
    return %c0_i32, %arg1 : i32, i32
  }
  func.func @transform_3(%arg0: i32, %arg1: i32) -> (i32, i32) {
    %c0_i32 = arith.constant 0 : i32
    %c0_i32_0 = arith.constant 0 : i32
    return %arg1, %c0_i32 : i32, i32
  }
  func.func @transform_4(%arg0: i32, %arg1: i32) -> (i32, i32) {
    %c0_i32 = arith.constant 0 : i32
    %c0_i32_0 = arith.constant 0 : i32
    %c0_i32_1 = arith.constant 0 : i32
    return %c0_i32, %c0_i32_0 : i32, i32
  }
  func.func @transform_5(%arg0: i32, %arg1: i32) -> (i32, i32) {
    %c0_i32 = arith.constant 0 : i32
    %c0_i32_0 = arith.constant 0 : i32
    return %arg0, %c0_i32 : i32, i32
  }
}

</mosaic_0001>

<bundles_post_ra>
// kernel: tpu_custom_call.1
= control target key start
LH: loop header
LB: loop body
LE: loop exit
PB: predicated region body
PF: predicated region fallthrough
CT: control target
= control target key end

     0   :  { %10 = vsyncpa [#allocation4], 0  ;;  %s3224_s0 = inlined_call_operand.vmem [shape: f32[24,128], index: 0, kind: input, shape index: {}]   ;;  %s3225_s1 = inlined_call_operand.vmem [shape: f32[128,64], index: 1, kind: input, shape index: {}]   ;;  %s3226_s2 = inlined_call_operand.vmem [shape: f32[1,64], index: 2, kind: input, shape index: {}]   ;;  %s3227_s3 = inlined_call_operand.vmem [shape: f32[64,128], index: 3, kind: input, shape index: {}]   ;;  %s3228_s4 = inlined_call_operand.vmem [shape: f32[3,128], index: 4, kind: input, shape index: {}]   ;;  %s3229_s5 = inlined_call_operand.hbm [shape: f32[24,128], index: 5, kind: output, shape index: {}]  }
   0x1   :  { %12 = vsyncpa [#allocation4 + $0x1], 0  ;;  %s2563_s18 = smov 0   ;;  %s2565_s19 = smov 0  }
   0x2   :  { %s2567_s20 = smov 0   ;;  %s2569_s21 = smov 0  }
   0x3   :  { %s2571_s22 = smov 0   ;;  %s2573_s23 = smov 0  }
   0x4 LB: > { %s1668_s24 = sadd.s32 4294967295, %s2527_s23   ;;  %s1669_s25 = sadd.s32 4294967294, %s2527_s23   ;;  %s2527_s23 = sphi %s2573_s23, %s18_s23   ;;  %s2523_s22 = sphi %s2571_s22, %s3271_s22   ;;  %s2519_s21 = sphi %s2569_s21, %s3270_s21   ;;  %s2515_s20 = sphi %s2567_s20, %s3269_s20   ;;  %s2511_s19 = sphi %s2565_s19, %s3268_s19   ;;  %s2507_s18 = sphi %s2563_s18, %s3267_s18  }
   0x5   : > { %s30_s26 = sadd.s32 1, %s2523_s22  ;;  %s162_s27 = sadd.s32 1, %s2515_s20 }
   0x6   : > { %p32_p0 = scmp.ge.s32.totalorder %s30_s26, 3  ;;  %p172_p1 = scmp.ne.s32.totalorder %s2515_s20, %s2511_s19 }
   0x7   : > { %p173_p2 = scmp.eq.s32.totalorder %s1668_s24, 2  ;;  %p178_p3 = scmp.ne.s32.totalorder %s2511_s19, %s2507_s18 }
   0x8   : > { %s3273_s26 = smov (%p32_p0, %s30_s26), 0  ;;  %p179_p5 = scmp.eq.s32.totalorder %s1669_s25, 2 }
   0x9   : > { %p2603_p4 = por %p173_p2, %p172_p1  ;;  %s159_s29 = ssub.s32 %s2523_s22, %s3273_s26 }
   0xa   : > { %p1675_p6 = scmp.ge.s32.totalorder %s2527_s23, 1  ;;  %p160_p7 = scmp.eq.s32.totalorder %s159_s29, 0 }
   0xb   : > { %p2610_p8 = por %p179_p5, %p178_p3  ;;  %p229_p9 = scmp.lt.s32.totalorder %s2527_s23, 4 }
   0xc   : > { %s2616_s6 = scalar_select %p160_p7, %s2515_s20, %s162_s27  }
   0xd   : > { %p230_p10 = pnand %p1675_p6, %p229_p9 }
   0xe   : > { %v2621_v0 = vld [vmem:[%s3225_s1] sm:$0xff] (!%p230_p10)  ;;  %v2626_v1 = vld [vmem:[%s3225_s1 + $0x8] sm:$0xff] (!%p230_p10)  ;;  %v2631_v2 = vld [vmem:[%s3225_s1 + $0x10] sm:$0xff] (!%p230_p10)  ;;  %v2529_v3 = vmov (!%p230_p10), 0.0|0.0   ;;  %vm2530_vm0 = vmmov (!%p230_p10), 0   ;;  %v3231_v10 = vmov (!%p230_p10), 0.0  }
   0xf   : > { %233 = sbr.rel (%p230_p10) target bundleno = 896 (0x380), region = 40  ;;  %2187 = vmatprep.subr.bf16.mxu0 (!%p230_p10), %v2529_v3  ;;  %v315_v4 = vand.u32 (!%p230_p10), 4294901760, %v2621_v0  ;;  %v318_v5 = vand.u32 (!%p230_p10), 4294901760, %v2626_v1  ;;  %v2639_v6 = vld [vmem:[%s3225_s1 + $0x18] sm:$0xff] (!%p230_p10)  ;;  %v321_v7 = vand.u32 (!%p230_p10), 4294901760, %v2631_v2  ;;  %v2645_v8 = vld [vmem:[%s3225_s1 + $0x20] sm:$0xff] (!%p230_p10)  ;;  %1906 = vmatprep.mubr.msk.f32.mxu0 (!%p230_p10), %vm2530_vm0, %v3231_v10 }
  0x10   : > { %v2650_v9 = vld [vmem:[%s3225_s1 + $0x28] sm:$0xff] (!%p230_p10)  ;;  %v324_v11 = vand.u32 (!%p230_p10), 4294901760, %v2639_v6  ;;  %v3242_v12 = vand.u32 (!%p230_p10), 4294901760, %v2645_v8  ;;  %v2660_v14 = vld [vmem:[%s3225_s1 + $0x30] sm:$0xff] (!%p230_p10)  ;;  %v2665_v15 = vld [vmem:[%s3225_s1 + $0x38] sm:$0xff] (!%p230_p10)  ;;  %2163 = vmatprep.subr.bf16.mxu1 (!%p230_p10), %v2529_v3  ;;  %1871 = vmatprep.mubr.msk.f32.mxu1 (!%p230_p10), %vm2530_vm0, %v3231_v10  ;;  %p268_p11 = scmp.lt.s32.totalorder (!%p230_p10), %s2519_s21, 2 }
  0x11   : > { %v3240_v13 = vand.u32 (!%p230_p10), 4294901760, %v2650_v9  ;;  %v2673_v16 = vsub.f32 (!%p230_p10), %v2621_v0, %v315_v4  ;;  %v2678_v17 = vsub.f32 (!%p230_p10), %v2626_v1, %v318_v5  ;;  %v2683_v18 = vsub.f32 (!%p230_p10), %v2631_v2, %v321_v7  ;;  %v2741_v40 = vld [vmem:[%s3225_s1 + $0x40] sm:$0xff] (!%p230_p10)  ;;  %v2746_v41 = vld [vmem:[%s3225_s1 + $0x48] sm:$0xff] (!%p230_p10)  ;;  %v2751_v45 = vld [vmem:[%s3225_s1 + $0x50] sm:$0xff] (!%p230_p10)  ;;  %s265_s25 = sand.u32 (!%p230_p10), 1, %s2511_s19   ;;  %s1680_s29 = sshll.u32 (!%p230_p10), %s2519_s21, 7 }
  0x12   : > { %v3239_v19 = vand.u32 (!%p230_p10), 4294901760, %v2660_v14  ;;  %v2689_v20 = vsub.f32 (!%p230_p10), %v2639_v6, %v324_v11  ;;  %v2694_v21 = vsub.f32 (!%p230_p10), %v2645_v8, %v3242_v12  ;;  %v3238_v23 = vand.u32 (!%p230_p10), 4294901760, %v2665_v15  ;;  %v2759_v48 = vld [vmem:[%s3225_s1 + $0x58] sm:$0xff] (!%p230_p10)  ;;  %v2764_v49 = vld [vmem:[%s3225_s1 + $0x60] sm:$0xff] (!%p230_p10)  ;;  %v2771_v54 = vld [vmem:[%s3225_s1 + $0x68] sm:$0xff] (!%p230_p10)  ;;  %s1676_s27 = sshll.u32 (!%p230_p10), %s265_s25, 3  ;;  %s3177_s11 = scalar_lea.hbm (!%p230_p10), %s3229_s5, %s1680_s29 }
  0x13   : > { %v2699_v22 = vsub.f32 (!%p230_p10), %v2650_v9, %v3240_v13  ;;  %v408_v24 = vand.u32 (!%p230_p10), 4294901760, %v2673_v16  ;;  %v415_v25 = vand.u32 (!%p230_p10), 4294901760, %v2678_v17  ;;  %v422_v26 = vand.u32 (!%p230_p10), 4294901760, %v2683_v18  ;;  %v2776_v55 = vld [vmem:[%s3225_s1 + $0x70] sm:$0xff] (!%p230_p10)  ;;  %s267_s7 = scalar_lea.vmem (!%p230_p10), [#allocation3], %s1676_s27  ;;  %s1546_s12 = scalar_lea.sflag (!%p230_p10), [#allocation4], %s265_s25 }
  0x14   : > { %v2708_v27 = vsub.f32 (!%p230_p10), %v2660_v14, %v3239_v19  ;;  %v429_v28 = vand.u32 (!%p230_p10), 4294901760, %v2689_v20  ;;  %v3246_v29 = vand.u32 (!%p230_p10), 4294901760, %v2694_v21  ;;  %v2716_v31 = vsub.f32 (!%p230_p10), %v2665_v15, %v3238_v23  ;;  %s1559_s8 = sshll.u32 (!%p230_p10), %s267_s7, 4  ;;  %s3179_s8 = int_to_ptr.vmem [resolvable:$true] %s1559_s8 }
  0x15   : > { %v3245_v30 = vand.u32 (!%p230_p10), 4294901760, %v2699_v22  ;;  %v409_v32 = vsub.f32 (!%p230_p10), %v2673_v16, %v408_v24  ;;  %v416_v33 = vsub.f32 (!%p230_p10), %v2678_v17, %v415_v25  ;;  %v423_v34 = vsub.f32 (!%p230_p10), %v2683_v18, %v422_v26 }
  0x16   : > { %v3244_v35 = vand.u32 4294901760, %v2708_v27  ;;  %v430_v36 = vsub.f32 %v2689_v20, %v429_v28  ;;  %v437_v37 = vsub.f32 %v2694_v21, %v3246_v29  ;;  %v3243_v39 = vand.u32 4294901760, %v2716_v31  ;;  %s269_s9 = scalar_select %p268_p11, %s2519_s21, 2 }
  0x17   : > { %v444_v38 = vsub.f32 %v2699_v22, %v3245_v30  ;;  %v410_v42 = vand.u32 4294901760, %v409_v32  ;;  %v417_v43 = vand.u32 4294901760, %v416_v33  ;;  %v424_v44 = vand.u32 4294901760, %v423_v34  ;;  %v2797_v32 = vld [vmem:[%s3225_s1 + $0x78] sm:$0xff]  ;;  %s2532_s21 = smov [#allocation3]  }
  0x18   : > { %v431_v46 = vand.u32 4294901760, %v430_v36  ;;  %v451_v47 = vsub.f32 %v2708_v27, %v3244_v35  ;;  %v438_v51 = vand.u32 4294901760, %v437_v37  ;;  %v3235_v52 = vand.u32 4294901760, %v2741_v40  ;;  %s1677_s10 = sshll.u32 %s269_s9, 3  ;;  %s2453_s14 = sshll.u32 %s2532_s21, 4  ;;  %s2454_s14 = int_to_ptr.vmem [resolvable:$false] %s2453_s14 }
  0x19   : > { %v2188_v50 = vpack.c.bf16 %v417_v43, %v410_v42  ;;  %v3234_v53 = vand.u32 4294901760, %v2746_v41  ;;  %v445_v57 = vand.u32 4294901760, %v444_v38  ;;  %v458_v58 = vsub.f32 %v2716_v31, %v3243_v39  ;;  %s271_s13 = scalar_lea.vmem %s3224_s0, %s1677_s10  ;;  %s2455_s15 = scalar_lea.vmem %s2454_s14, 256 }
  0x1a   : > { %v2191_v56 = vpack.c.bf16 %v431_v46, %v424_v44  ;;  %v3230_v59 = vand.u32 4294901760, %v2751_v45  ;;  %v2785_v60 = vsub.f32 %v2741_v40, %v3235_v52  ;;  %v3233_v62 = vand.u32 4294901760, %v2759_v48  ;;  %p2456_p1 = scmp.lt.s32.totalorder %s3179_s8, %s2454_s14 }
  0x1b   : > { %2189 = vmatpush3.bf16.msra.mxu0 %v2188_v50  ;;  %v2790_v61 = vsub.f32 %v2746_v41, %v3234_v53  ;;  %v3237_v63 = vand.u32 4294901760, %v2764_v49  ;;  %v452_v33 = vand.u32 4294901760, %v451_v47  ;;  %v3236_v36 = vand.u32 4294901760, %v2771_v54 }
  0x1c   : > { %2190 = vmatprep.subr.bf16.mxu0 %v2529_v3  ;;  %v2803_v34 = vsub.f32 %v2751_v45, %v3230_v59  ;;  %v3241_v37 = vand.u32 4294901760, %v2776_v55  ;;  %v464_v38 = vand.u32 4294901760, %v2785_v60  ;;  %v2812_v43 = vsub.f32 %v2759_v48, %v3233_v62 }
  0x1d   : > { %v471_v42 = vand.u32 4294901760, %v2790_v61  ;;  %v2817_v44 = vsub.f32 %v2764_v49, %v3237_v63  ;;  %v2194_v46 = vpack.c.bf16 %v445_v57, %v438_v51  ;;  %v2823_v50 = vsub.f32 %v2771_v54, %v3236_v36 }
  0x1e   : > { %v478_v47 = vand.u32 4294901760, %v2803_v34  ;;  %v3247_v59 = vand.u32 4294901760, %v2797_v32  ;;  %v459_v10 = vand.u32 4294901760, %v458_v58  ;;  %v465_v62 = vsub.f32 %v2785_v60, %v464_v38 }
  0x1f   : > { %2192 = vmatpush3.bf16.msra.mxu0 %v2191_v56  ;;  %v472_v53 = vsub.f32 %v2790_v61, %v471_v42  ;;  %v485_v52 = vand.u32 4294901760, %v2812_v43  ;;  %v492_v51 = vand.u32 4294901760, %v2817_v44  ;;  %v2834_v57 = vsub.f32 %v2776_v55, %v3241_v37 }
  0x20   : > { %2193 = vmatprep.subr.bf16.mxu0 %v2529_v3  ;;  %v479_v36 = vsub.f32 %v2803_v34, %v478_v47  ;;  %v499_v58 = vand.u32 4294901760, %v2823_v50  ;;  %v2842_v63 = vsub.f32 %v2797_v32, %v3247_v59  ;;  %v2197_v23 = vpack.c.bf16 %v459_v10, %v452_v33 }
  0x21   : > { %v486_v56 = vsub.f32 %v2812_v43, %v485_v52  ;;  %v466_v19 = vand.u32 4294901760, %v465_v62  ;;  %v473_v13 = vand.u32 4294901760, %v472_v53  ;;  %v493_v37 = vsub.f32 %v2817_v44, %v492_v51 }
  0x22   : > { %v506_v12 = vand.u32 4294901760, %v2834_v57  ;;  %v480_v39 = vand.u32 4294901760, %v479_v36  ;;  %v500_v30 = vsub.f32 %v2823_v50, %v499_v58  ;;  %v513_v29 = vand.u32 4294901760, %v2842_v63 }
  0x23   : > { %2195 = vmatpush3.bf16.msra.mxu0 %v2194_v46  ;;  %v487_v35 = vand.u32 4294901760, %v486_v56  ;;  %v2200_v59 = vpack.c.bf16 %v473_v13, %v466_v19  ;;  %v2854_v10 = vpack.c.bf16 %v318_v5, %v315_v4  ;;  %v494_v33 = vand.u32 4294901760, %v493_v37 }
  0x24   : > { %2196 = vmatprep.subr.bf16.mxu0 %v2529_v3  ;;  %v507_v53 = vsub.f32 %v2834_v57, %v506_v12  ;;  %v501_v36 = vand.u32 4294901760, %v500_v30  ;;  %v514_v46 = vsub.f32 %v2842_v63, %v513_v29  ;;  %v2865_v0 = vpack.c.bf16 %v324_v11, %v321_v7 }
  0x25   : > { %v2203_v62 = vpack.c.bf16 %v487_v35, %v480_v39  ;;  %2165 = vmatpush3.bf16.msra.mxu1 %v2854_v10  ;;  %v2871_v1 = vpack.c.bf16 %v415_v25, %v408_v24  ;;  %v2877_v4 = vpack.c.bf16 %v429_v28, %v422_v26  ;;  %v3250_v5 = vand.u32 4294901760, %v2694_v21 }
  0x26   : > { %v3251_v2 = vand.u32 4294901760, %v2699_v22  ;;  %2166 = vmatprep.subr.bf16.mxu1 %v2529_v3  ;;  %v3252_v6 = vand.u32 4294901760, %v2708_v27  ;;  %v3253_v7 = vand.u32 4294901760, %v2716_v31  ;;  %v2892_v19 = vpack.c.bf16 %v471_v42, %v464_v38 }
  0x27   : > { %2198 = vmatpush3.bf16.msra.mxu0 %v2197_v23  ;;  %v2894_v23 = vpack.c.bf16 %v485_v52, %v478_v47  ;;  %v2896_v24 = vpack.c.bf16 %v499_v58, %v492_v51  ;;  %v2899_v25 = vpack.c.bf16 %v513_v29, %v506_v12  ;;  %v2206_v26 = vpack.c.bf16 %v501_v36, %v494_v33  ;;  %v2915_v29 = vld [vmem:[%s271_s13] sm:$0xff]  ;;  %v962_v36 = vld [vmem:[%s3227_s3 + $0x28] sm:$0xff]  ;;  %s2449_s13 = scalar_lea.vmem %s3179_s8, 128 }
  0x28   : > { %2199 = vmatprep.subr.bf16.mxu0 %v2529_v3  ;;  %v2883_v13 = vpack.c.bf16 %v3251_v2, %v3250_v5  ;;  %v2890_v11 = vpack.c.bf16 %v3253_v7, %v3252_v6  ;;  %v508_v28 = vand.u32 4294901760, %v507_v53  ;;  %v515_v30 = vand.u32 4294901760, %v514_v46  ;;  %v961_v33 = vld [vmem:[%s3227_s3 + $0x20] sm:$0xff]  ;;  %v963_v2 = vld [vmem:[%s3227_s3 + $0x30] sm:$0xff]  ;;  %p2450_p12 = scmp.ne.s32.totalorder %s3179_s8, %s2449_s13  ;;  %p2457_p2 = scmp.lt.s32.totalorder %s2455_s15, %s2449_s13 }
  0x29   : > { %2168 = vmatpush3.bf16.msra.mxu1 %v2865_v0  ;;  %v3254_v35 = vand.u32 4294901760, %v2645_v8  ;;  %v3255_v39 = vand.u32 4294901760, %v2650_v9  ;;  %v3256_v8 = vand.u32 4294901760, %v2660_v14  ;;  %v3257_v9 = vand.u32 4294901760, %v2665_v15 }
  0x2a   : > { %2169 = vmatprep.subr.bf16.mxu1 %v2529_v3  ;;  %v2209_v12 = vpack.c.bf16 %v515_v30, %v508_v28  ;;  %v2926_v37 = vand.u32 4294901760, %v2915_v29  ;;  %v2212_v38 = vpack.c.bf16 %v2678_v17, %v2673_v16  ;;  %v3258_v42 = vand.u32 4294901760, %v2741_v40  ;;  %p2451_p13 = pnand %p2450_p12, %p2603_p4  ;;  %p2458_p3 = por %p2457_p2, %p2456_p1 }
  0x2b   : > { %2201 = vmatpush3.bf16.msra.mxu0 %v2200_v59  ;;  %v2907_v52 = vpack.c.bf16 %v3255_v39, %v3254_v35  ;;  %v2921_v59 = vpack.c.bf16 %v3257_v9, %v3256_v8  ;;  %v3259_v14 = vand.u32 4294901760, %v2746_v41  ;;  %v2215_v47 = vpack.c.bf16 %v2689_v20, %v2683_v18 }
  0x2c   : > { %2202 = vmatprep.subr.bf16.mxu0 %v2529_v3  ;;  %v3260_v51 = vmov 0.0   ;;  %v3261_v16 = vand.u32 4294901760, %v2751_v45  ;;  %v3262_v17 = vand.u32 4294901760, %v2759_v48  ;;  %v396_v41 = vsub.f32 %v2915_v29, %v2926_v37  ;;  %p2452_p0 = pneg %p2451_p13 }
  0x2d   : > { %2171 = vmatpush3.bf16.msra.mxu1 %v2907_v52  ;;  %v2935_v15 = vpack.c.bf16 %v3259_v14, %v3258_v42  ;;  %v2218_v18 = vpack.c.bf16 %v2699_v22, %v2694_v21  ;;  %v3263_v20 = vand.u32 4294901760, %v2764_v49  ;;  %v3264_v45 = vand.u32 4294901760, %v2771_v54 }
  0x2e   : > { %2172 = vmatprep.subr.bf16.mxu1 %v2529_v3  ;;  %v2949_v40 = vpack.c.bf16 %v3262_v17, %v3261_v16  ;;  %v397_v56 = vand.u32 4294901760, %v396_v41  ;;  %v2221_v53 = vpack.c.bf16 %v2716_v31, %v2708_v27  ;;  %v3266_v21 = vand.u32 4294901760, %v2797_v32  ;;  %p2459_p5 = pnand %p2458_p3, %p2452_p0 }
  0x2f   : > { %2204 = vmatpush3.bf16.msra.mxu0 %v2203_v62  ;;  %v2962_v48 = vpack.c.bf16 %v3264_v45, %v3263_v20  ;;  %v3265_v62 = vand.u32 4294901760, %v2776_v55  ;;  %v2224_v54 = vpack.c.bf16 %v2790_v61, %v2785_v60  ;;  %v2227_v27 = vpack.c.bf16 %v2812_v43, %v2803_v34  ;;  %v957_v60 = vld [vmem:[%s3227_s3] sm:$0xff]  ;;  %v958_v61 = vld [vmem:[%s3227_s3 + $0x8] sm:$0xff]  ;;  %v959_v43 = vld [vmem:[%s3227_s3 + $0x10] sm:$0xff] }
  0x30   : > { %2205 = vmatprep.subr.bf16.mxu0 %v2529_v3  ;;  %v398_v58 = vsub.f32 %v396_v41, %v397_v56  ;;  %v2230_v31 = vpack.c.bf16 %v2823_v50, %v2817_v44  ;;  %v2233_v55 = vpack.c.bf16 %v2842_v63, %v2834_v57  ;;  %v970_v63 = vand.u32 4294901760, %v957_v60  ;;  %v960_v44 = vld [vmem:[%s3227_s3 + $0x18] sm:$0xff] }
  0x31   : > { %2174 = vmatpush3.bf16.msra.mxu1 %v2921_v59  ;;  %v2973_v22 = vpack.c.bf16 %v3266_v21, %v3265_v62  ;;  %v973_v32 = vand.u32 4294901760, %v958_v61  ;;  %v976_v50 = vand.u32 4294901760, %v959_v43  ;;  %v979_v57 = vand.u32 4294901760, %v960_v44 }
  0x32   : > { %2175 = vmatprep.subr.bf16.mxu1 %v2529_v3  ;;  %v399_v49 = vand.u32 4294901760, %v398_v58  ;;  %v982_v46 = vand.u32 4294901760, %v961_v33  ;;  %v988_v6 = vand.u32 4294901760, %v963_v2  ;;  %vm965_vm1 = vcmask 523264  }
  0x33   : > { %2207 = vmatpush3.bf16.msra.mxu0 %v2206_v26  ;;  %v3054_v34 = vpack.c.bf16 %v973_v32, %v970_v63 }
  0x34   : > { %2208 = vmatprep.subr.bf16.mxu0 %v2529_v3  ;;  %v3100_v30 = vsub.f32 %v963_v2, %v988_v6 }
  0x35   : > { %2177 = vmatpush3.bf16.msra.mxu1 %v2935_v15 }
  0x36   : > { %2178 = vmatprep.subr.bf16.mxu1 %v2529_v3 }
  0x37   : > { %2210 = vmatpush3.bf16.msra.mxu0 %v2209_v12 }
  0x38   : > { %2211 = vmatprep.subr.bf16.mxu0 %v2529_v3 }
  0x39   : > { %2180 = vmatpush3.bf16.msra.mxu1 %v2949_v40 }
  0x3a   : > { %1907 = vmatmul.mubr.f32.vlgmr.msra.gmra.mrb[0].mxu0 %v2926_v37  ;;  %2181 = vmatprep.subr.bf16.mxu1 %v2529_v3 }
  0x3b   : > { %2213 = vmatpush3.bf16.msra.mxu0 %v2212_v38  ;;  %1941 = vmatprep.mubr.msk.f32.mxu0 %vm2530_vm0, %v3260_v51 }
  0x3c   : > { %2214 = vmatprep.subr.bf16.mxu0 %v2529_v3 }
  0x3d   : > { %2183 = vmatpush3.bf16.msra.mxu1 %v2962_v48 }
  0x3e   : > { %2184 = vmatprep.subr.bf16.mxu1 %v2529_v3 }
  0x3f   : > { %2216 = vmatpush3.bf16.msra.mxu0 %v2215_v47 }
  0x40   : > { %2217 = vmatprep.subr.bf16.mxu0 %v2529_v3 }
  0x41   : > { %2186 = vmatpush3.bf16.msra.mxu1 %v2973_v22 }
  0x42   : > { %2307 = vmatprep.subr.bf16.mxu1 %v2529_v3 }
  0x43   : > { %2219 = vmatpush3.bf16.msra.mxu0 %v2218_v18 }
  0x44   : > { %2220 = vmatprep.subr.bf16.mxu0 %v2529_v3  ;;  %1872 = vmatmul.mubr.f32.vlgmr.msra.gmra.mrb[0].mxu1 %v399_v49 }
  0x45   : > { %2065 = vmatprep.mubr.msk.f32.mxu1 %vm2530_vm0, %v3260_v51  ;;  %2309 = vmatpush3.bf16.msra.mxu1 %v3054_v34 }
  0x46   : > { %2310 = vmatprep.subr.bf16.mxu1 %v2529_v3 }
  0x47   : > { %2222 = vmatpush3.bf16.msra.mxu0 %v2221_v53 }
  0x48   : > { %2223 = vmatprep.subr.bf16.mxu0 %v2529_v3 }
  0x4b   : > { %2225 = vmatpush3.bf16.msra.mxu0 %v2224_v54 }
  0x4c   : > { %2226 = vmatprep.subr.bf16.mxu0 %v2529_v3 }
  0x4f   : > { %2228 = vmatpush3.bf16.msra.mxu0 %v2227_v27 }
  0x50   : > { %2229 = vmatprep.subr.bf16.mxu0 %v2529_v3 }
  0x53   : > { %2231 = vmatpush3.bf16.msra.mxu0 %v2230_v31 }
  0x54   : > { %2232 = vmatprep.subr.bf16.mxu0 %v2529_v3 }
  0x57   : > { %2234 = vmatpush3.bf16.msra.mxu0 %v2233_v55 }
  0x58   : > { %2235 = vmatprep.subr.bf16.mxu0 %v2529_v3 }
  0x5a   : > { %1942 = vmatmul.mubr.f32.vlgmr.msra.gmra.mrb[0].mxu0 %v396_v41 }
  0x5b   : > { %2237 = vmatpush3.bf16.msra.mxu0 %v2854_v10  ;;  %1976 = vmatprep.mubr.msk.f32.mxu0 %vm2530_vm0, %v3260_v51 }
  0x5c   : > { %2238 = vmatprep.subr.bf16.mxu0 %v2529_v3 }
  0x5f   : > { %2240 = vmatpush3.bf16.msra.mxu0 %v2865_v0 }
  0x60   : > { %2241 = vmatprep.subr.bf16.mxu0 %v2529_v3 }
  0x63   : > { %2243 = vmatpush3.bf16.msra.mxu0 %v2907_v52 }
  0x64   : > { %2244 = vmatprep.subr.bf16.mxu0 %v2529_v3 }
  0x67   : > { %2246 = vmatpush3.bf16.msra.mxu0 %v2921_v59 }
  0x68   : > { %2247 = vmatprep.subr.bf16.mxu0 %v2529_v3 }
  0x6b   : > { %2249 = vmatpush3.bf16.msra.mxu0 %v2935_v15 }
  0x6c   : > { %2250 = vmatprep.subr.bf16.mxu0 %v2529_v3 }
  0x6f   : > { %2252 = vmatpush3.bf16.msra.mxu0 %v2949_v40 }
  0x70   : > { %2253 = vmatprep.subr.bf16.mxu0 %v2529_v3 }
  0x73   : > { %2255 = vmatpush3.bf16.msra.mxu0 %v2962_v48 }
  0x74   : > { %2256 = vmatprep.subr.bf16.mxu0 %v2529_v3 }
  0x77   : > { %2258 = vmatpush3.bf16.msra.mxu0 %v2973_v22 }
  0x78   : > { %2259 = vmatprep.subr.bf16.mxu0 %v2529_v3 }
  0x7a   : > { %1977 = vmatmul.mubr.f32.vlgmr.msra.gmra.mrb[0].mxu0 %v397_v56 }
  0x7b   : > { %2261 = vmatpush3.bf16.msra.mxu0 %v2871_v1  ;;  %2011 = vmatprep.mubr.msk.f32.mxu0 %vm2530_vm0, %v3260_v51  ;;  %v3074_v1 = vsub.f32 %v957_v60, %v970_v63 }
  0x7c   : > { %2262 = vmatprep.subr.bf16.mxu0 %v2529_v3 }
  0x7f   : > { %2264 = vmatpush3.bf16.msra.mxu0 %v2877_v4  ;;  %v3076_v4 = vsub.f32 %v958_v61, %v973_v32 }
  0x80   : > { %2265 = vmatprep.subr.bf16.mxu0 %v2529_v3 }
  0x81   : > { %v2332_v27 = vpack.c.bf16 %v3076_v4, %v3074_v1 }
  0x83   : > { %2267 = vmatpush3.bf16.msra.mxu0 %v2883_v13  ;;  %v964_v13 = vld [vmem:[%s3227_s3 + $0x38] sm:$0xff] }
  0x84   : > { %2268 = vmatprep.subr.bf16.mxu0 %v2529_v3  ;;  %v991_v7 = vand.u32 4294901760, %v964_v13 }
  0x86   : > { %v3098_v28 = vpack.c.bf16 %v991_v7, %v988_v6  ;;  %v3102_v35 = vsub.f32 %v964_v13, %v991_v7 }
  0x87   : > { %2270 = vmatpush3.bf16.msra.mxu0 %v2890_v11  ;;  %v1055_v11 = vand.u32 4294901760, %v3074_v1 }
  0x88   : > { %2271 = vmatprep.subr.bf16.mxu0 %v2529_v3  ;;  %v1104_v58 = vand.u32 4294901760, %v3102_v35  ;;  %v2341_v60 = vpack.c.bf16 %v3102_v35, %v3100_v30 }
  0x89   : > { %v1056_v39 = vsub.f32 %v3074_v1, %v1055_v11 }
  0x8a   : > { %v1105_v21 = vsub.f32 %v3102_v35, %v1104_v58 }
  0x8b   : > { %2273 = vmatpush3.bf16.msra.mxu0 %v2892_v19  ;;  %v1062_v19 = vand.u32 4294901760, %v3076_v4  ;;  %v1057_v12 = vand.u32 4294901760, %v1056_v39 }
  0x8c   : > { %2274 = vmatprep.subr.bf16.mxu0 %v2529_v3  ;;  %v1106_v49 = vand.u32 4294901760, %v1105_v21 }
  0x8d   : > { %v2356_v61 = vpack.c.bf16 %v1062_v19, %v1055_v11 }
  0x8f   : > { %2276 = vmatpush3.bf16.msra.mxu0 %v2894_v23  ;;  %v3090_v23 = vsub.f32 %v959_v43, %v976_v50 }
  0x90   : > { %2277 = vmatprep.subr.bf16.mxu0 %v2529_v3 }
  0x91   : > { %v1069_v8 = vand.u32 4294901760, %v3090_v23 }
  0x93   : > { %2279 = vmatpush3.bf16.msra.mxu0 %v2896_v24  ;;  %v3092_v24 = vsub.f32 %v960_v44, %v979_v57  ;;  %v1070_v42 = vsub.f32 %v3090_v23, %v1069_v8  ;;  %v1678_v44 = vld [vmem:[%s3226_s2] ss:$0 sm:$0xff] }
  0x94   : > { %2280 = vmatprep.subr.bf16.mxu0 %v2529_v3 }
  0x95   : > { %v1076_v9 = vand.u32 4294901760, %v3092_v24  ;;  %v1071_v47 = vand.u32 4294901760, %v1070_v42  ;;  %v2335_v31 = vpack.c.bf16 %v3092_v24, %v3090_v23 }
  0x97   : > { %2282 = vmatpush3.bf16.msra.mxu0 %v2899_v25  ;;  %v3094_v25 = vsub.f32 %v961_v33, %v982_v46  ;;  %v1077_v14 = vsub.f32 %v3092_v24, %v1076_v9  ;;  %v2359_v63 = vpack.c.bf16 %v1076_v9, %v1069_v8 }
  0x98   : > { %2283 = vmatprep.subr.bf16.mxu0 %v2529_v3 }
  0x99   : > { %v1078_v16 = vand.u32 4294901760, %v1077_v14  ;;  %v1083_v17 = vand.u32 4294901760, %v3094_v25 }
  0x9a   : > { %2012 = vmatmul.mubr.f32.vlgmr.msra.gmra.mrb[0].mxu0 %v2926_v37 }
  0x9b   : > { %2285 = vmatpush3.bf16.msra.mxu0 %v2854_v10  ;;  %2046 = vmatprep.mubr.msk.f32.mxu0 %vm2530_vm0, %v3260_v51  ;;  %v3064_v10 = vpack.c.bf16 %v979_v57, %v976_v50  ;;  %v2323_v41 = vpack.c.bf16 %v1078_v16, %v1071_v47  ;;  %v1084_v56 = vsub.f32 %v3094_v25, %v1083_v17 }
  0x9c   : > { %2286 = vmatprep.subr.bf16.mxu0 %v2529_v3 }
  0x9d   : > { %2312 = vmatpush3.bf16.msra.mxu1 %v3064_v10  ;;  %v1085_v20 = vand.u32 4294901760, %v1084_v56 }
  0x9e   : > { %2313 = vmatprep.subr.bf16.mxu1 %v2529_v3 }
  0x9f   : > { %2288 = vmatpush3.bf16.msra.mxu0 %v2865_v0  ;;  %v985_v0 = vand.u32 4294901760, %v962_v36 }
  0xa0   : > { %2289 = vmatprep.subr.bf16.mxu0 %v2529_v3 }
  0xa1   : > { %v3078_v5 = vpack.c.bf16 %v985_v0, %v982_v46  ;;  %v3096_v26 = vsub.f32 %v962_v36, %v985_v0 }
  0xa3   : > { %2291 = vmatpush3.bf16.msra.mxu0 %v2907_v52  ;;  %2315 = vmatpush3.bf16.msra.mxu1 %v3078_v5  ;;  %v1063_v52 = vsub.f32 %v3076_v4, %v1062_v19  ;;  %v2338_v55 = vpack.c.bf16 %v3096_v26, %v3094_v25 }
  0xa4   : > { %2292 = vmatprep.subr.bf16.mxu0 %v2529_v3  ;;  %2316 = vmatprep.subr.bf16.mxu1 %v2529_v3 }
  0xa7   : > { %2294 = vmatpush3.bf16.msra.mxu0 %v2921_v59  ;;  %2318 = vmatpush3.bf16.msra.mxu1 %v3098_v28 }
  0xa8   : > { %2295 = vmatprep.subr.bf16.mxu0 %v2529_v3  ;;  %2319 = vmatprep.subr.bf16.mxu1 %v2529_v3 }
  0xab   : > { %2297 = vmatpush3.bf16.msra.mxu0 %v2935_v15 }
  0xac   : > { %2298 = vmatprep.subr.bf16.mxu0 %v2529_v3 }
  0xaf   : > { %2300 = vmatpush3.bf16.msra.mxu0 %v2949_v40  ;;  %v1090_v40 = vand.u32 4294901760, %v3096_v26 }
  0xb0   : > { %2301 = vmatprep.subr.bf16.mxu0 %v2529_v3 }
  0xb1   : > { %v1091_v18 = vsub.f32 %v3096_v26, %v1090_v40  ;;  %v2362_v32 = vpack.c.bf16 %v1090_v40, %v1083_v17 }
  0xb3   : > { %2303 = vmatpush3.bf16.msra.mxu0 %v2962_v48  ;;  %v1092_v45 = vand.u32 4294901760, %v1091_v18  ;;  %v1097_v48 = vand.u32 4294901760, %v3100_v30 }
  0xb4   : > { %2304 = vmatprep.subr.bf16.mxu0 %v2529_v3 }
  0xb5   : > { %v2326_v53 = vpack.c.bf16 %v1092_v45, %v1085_v20  ;;  %v1098_v62 = vsub.f32 %v3100_v30, %v1097_v48  ;;  %v2365_v43 = vpack.c.bf16 %v1104_v58, %v1097_v48 }
  0xb7   : > { %2306 = vmatpush3.bf16.msra.mxu0 %v2973_v22  ;;  %v1099_v22 = vand.u32 4294901760, %v1098_v62 }
  0xb9   : > { %v2329_v54 = vpack.c.bf16 %v1106_v49, %v1099_v22 }
  0xba   : > { %2047 = vmatmul.mubr.f32.vlgmr.msra.gmra.mrb[0].mxu0 %v2926_v37  ;;  %v1064_v37 = vand.u32 4294901760, %v1063_v52 }
  0xbc   : > { %v2320_v15 = vpack.c.bf16 %v1064_v37, %v1057_v12 }
 0x117   : > { %v401_v59 = vpop.f32.mrb[0].mxu1 }
 0x118   : > { %v1873_v38 = vpop.f32.mrb[1].mxu1  ;;  %v402_v50 = vadd.f32 %v1678_v44, %v401_v59 }
 0x18d   : > { %v951_v57 = vpop.f32.mrb[0].mxu0 }
 0x18e   : > { %v2380_v33 = vadd.f32 %v951_v57, %v402_v50  ;;  %v2048_v36 = vpop.f32.mrb[1].mxu0 }
 0x190   : > { %v955_v46 = vmax.f32 %v2380_v33, 0.0 }
 0x192   : > { %v967_v0 = vsel %vm965_vm1, %v955_v46, 0 }
 0x193   : > { %v1042_v1 = vand.u32 4294901760, %v967_v0 }
 0x195   : > { %v1043_v4 = vsub.f32 %v967_v0, %v1042_v1 }
 0x197   : > { %v1044_v2 = vand.u32 4294901760, %v1043_v4 }
 0x199   : > { %v1045_v13 = vsub.f32 %v1043_v4, %v1044_v2 }
 0x19b   : > { %v1046_v6 = vand.u32 4294901760, %v1045_v13 }
 0x19d   : > { %2066 = vmatmul.mubr.f32.vlgmr.msra.gmra.mrb[2].mxu1 %v1046_v6 }
 0x19e   : > { %2321 = vmatpush3.bf16.msra.mxu1 %v2320_v15  ;;  %2084 = vmatprep.mubr.msk.f32.mxu1 %vm2530_vm0, %v3260_v51 }
 0x19f   : > { %2322 = vmatprep.subr.bf16.mxu1 %v2529_v3 }
 0x1a2   : > { %2324 = vmatpush3.bf16.msra.mxu1 %v2323_v41 }
 0x1a3   : > { %2325 = vmatprep.subr.bf16.mxu1 %v2529_v3 }
 0x1a6   : > { %2327 = vmatpush3.bf16.msra.mxu1 %v2326_v53 }
 0x1a7   : > { %2328 = vmatprep.subr.bf16.mxu1 %v2529_v3 }
 0x1aa   : > { %2330 = vmatpush3.bf16.msra.mxu1 %v2329_v54 }
 0x1ab   : > { %2331 = vmatprep.subr.bf16.mxu1 %v2529_v3 }
 0x1ad   : > { %2085 = vmatmul.mubr.f32.vlgmr.msra.gmra.mrb[4].mxu1 %v1042_v1 }
 0x1ae   : > { %2333 = vmatpush3.bf16.msra.mxu1 %v2332_v27  ;;  %2103 = vmatprep.mubr.msk.f32.mxu1 %vm2530_vm0, %v3260_v51 }
 0x1af   : > { %2334 = vmatprep.subr.bf16.mxu1 %v2529_v3 }
 0x1b2   : > { %2336 = vmatpush3.bf16.msra.mxu1 %v2335_v31 }
 0x1b3   : > { %2337 = vmatprep.subr.bf16.mxu1 %v2529_v3 }
 0x1b6   : > { %2339 = vmatpush3.bf16.msra.mxu1 %v2338_v55 }
 0x1b7   : > { %2340 = vmatprep.subr.bf16.mxu1 %v2529_v3 }
 0x1ba   : > { %2342 = vmatpush3.bf16.msra.mxu1 %v2341_v60 }
 0x1bb   : > { %2343 = vmatprep.subr.bf16.mxu1 %v2529_v3 }
 0x1bd   : > { %2104 = vmatmul.mubr.f32.vlgmr.msra.gmra.mrb[6].mxu1 %v1043_v4 }
 0x1be   : > { %2345 = vmatpush3.bf16.msra.mxu1 %v3054_v34  ;;  %2122 = vmatprep.mubr.msk.f32.mxu1 %vm2530_vm0, %v3260_v51 }
 0x1bf   : > { %2346 = vmatprep.subr.bf16.mxu1 %v2529_v3 }
 0x1c2   : > { %2348 = vmatpush3.bf16.msra.mxu1 %v3064_v10 }
 0x1c3   : > { %2349 = vmatprep.subr.bf16.mxu1 %v2529_v3 }
 0x1c6   : > { %2351 = vmatpush3.bf16.msra.mxu1 %v3078_v5 }
 0x1c7   : > { %2352 = vmatprep.subr.bf16.mxu1 %v2529_v3 }
 0x1ca   : > { %2354 = vmatpush3.bf16.msra.mxu1 %v3098_v28 }
 0x1cb   : > { %2355 = vmatprep.subr.bf16.mxu1 %v2529_v3 }
 0x1cd   : > { %2123 = vmatmul.mubr.f32.vlgmr.msra.gmra.mrb[8].mxu1 %v1044_v2 }
 0x1ce   : > { %2357 = vmatpush3.bf16.msra.mxu1 %v2356_v61  ;;  %2141 = vmatprep.mubr.msk.f32.mxu1 %vm2530_vm0, %v3260_v51 }
 0x1cf   : > { %2358 = vmatprep.subr.bf16.mxu1 %v2529_v3 }
 0x1d2   : > { %2360 = vmatpush3.bf16.msra.mxu1 %v2359_v63 }
 0x1d3   : > { %2361 = vmatprep.subr.bf16.mxu1 %v2529_v3 }
 0x1d6   : > { %2363 = vmatpush3.bf16.msra.mxu1 %v2362_v32 }
 0x1d7   : > { %2364 = vmatprep.subr.bf16.mxu1 %v2529_v3 }
 0x1da   : > { %2366 = vmatpush3.bf16.msra.mxu1 %v2365_v43 }
 0x1db   : > { %2367 = vmatprep.subr.bf16.mxu1 %v2529_v3 }
 0x1dd   : > { %2142 = vmatmul.mubr.f32.vlgmr.msra.gmra.mrb[10].mxu1 %v1042_v1 }
 0x1de   : > { %2369 = vmatpush3.bf16.msra.mxu1 %v3054_v34  ;;  %2160 = vmatprep.mubr.msk.f32.mxu1 %vm2530_vm0, %v3260_v51 }
 0x1df   : > { %2370 = vmatprep.subr.bf16.mxu1 %v2529_v3 }
 0x1e2   : > { %2372 = vmatpush3.bf16.msra.mxu1 %v3064_v10 }
 0x1e3   : > { %2373 = vmatprep.subr.bf16.mxu1 %v2529_v3 }
 0x1e6   : > { %2375 = vmatpush3.bf16.msra.mxu1 %v3078_v5  ;;  %v1513_v5 = vlaneseq }
 0x1e7   : > { %2376 = vmatprep.subr.bf16.mxu1 %v2529_v3 }
 0x1e8   : > { %v1514_v12 = vshrl.u32 %v1513_v5, 7 }
 0x1ea   : > { %2378 = vmatpush3.bf16.msra.mxu1 %v3098_v28  ;;  %v1515_v3 = vsub.s32 0, %v1514_v12  ;;  %v1511_v28 = vld [vmem:[%s3228_s4] sm:$0x7]  ;;  %v1536_v20 = vsub.s32 1, %v1514_v12  ;;  %v1541_v45 = vsub.s32 2, %v1514_v12 }
 0x1ec   : > { %v1516_v8 = vrot.slane %v1511_v28, %v1515_v3  ;;  %v1537_v48 = vrot.slane %v1511_v28, %v1536_v20  ;;  %v1542_v62 = vrot.slane %v1511_v28, %v1541_v45 }
 0x1ed   : > { %2161 = vmatmul.mubr.f32.vlgmr.msra.gmra.mrb[12].mxu1 %v1042_v1 }
 0x270   : > { %v1048_v7 = vpop.f32.mrb[2].mxu1 }
 0x271   : > { %v2067_v11 = vpop.f32.mrb[3].mxu1 }
 0x280   : > { %v1159_v19 = vpop.f32.mrb[4].mxu1 }
 0x281   : > { %v1160_v34 = vadd.f32 %v1159_v19, %v1048_v7  ;;  %v2086_v23 = vpop.f32.mrb[5].mxu1 }
 0x290   : > { %v1247_v24 = vpop.f32.mrb[6].mxu1 }
 0x291   : > { %v1248_v51 = vadd.f32 %v1247_v24, %v1160_v34  ;;  %v2105_v25 = vpop.f32.mrb[7].mxu1 }
 0x2a0   : > { %v1328_v26 = vpop.f32.mrb[8].mxu1 }
 0x2a1   : > { %v1329_v30 = vadd.f32 %v1328_v26, %v1248_v51  ;;  %v2124_v10 = vpop.f32.mrb[9].mxu1 }
 0x2b0   : > { %v1423_v35 = vpop.f32.mrb[10].mxu1 }
 0x2b1   : > { %v1424_v39 = vadd.f32 %v1423_v35, %v1329_v30  ;;  %v2143_v52 = vpop.f32.mrb[11].mxu1 }
 0x2c0   : > { %v1502_v9 = vpop.f32.mrb[12].mxu1 }
 0x2c1   : > { %v1503_v59 = vadd.f32 %v1502_v9, %v1424_v39  ;;  %v2162_v37 = vpop.f32.mrb[13].mxu1 }
 0x2c3   : > { %v1517_v38 = vadd.f32 %v1516_v8, %v1503_v59 }
 0x2c5   : > { %v1519_v42 = vadd.f32 %v1517_v38, %v2915_v29 }
 0x2c7   : > { %1520 = vadd.xlane.f32.xlu0 %v1519_v42  ;;  %v1523_v14 = vmul.f32 %v1519_v42, %v1519_v42 }
 0x2cb   : > { %1524 = vadd.xlane.f32.xlu0 %v1523_v14 }
 0x354   : > { %v1521_v15 = vpop.xlane.xlu0 %1520 }
 0x355   : > { %v1522_v47 = vmul.f32 0.03125, %v1521_v15 }
 0x357   : > { %v1527_v17 = vmul.f32 %v1522_v47, %v1522_v47  ;;  %v1530_v29 = vsub.f32 %v1519_v42, %v1522_v47 }
 0x358   : > { %v1525_v16 = vpop.xlane.xlu0 %1524 }
 0x359   : > { %v1526_v40 = vmul.f32 0.03125, %v1525_v16 }
 0x35b   : > { %v1528_v41 = vsub.f32 %v1526_v40, %v1527_v17 }
 0x35d   : > { %v1529_v56 = vmax.f32 %v1528_v41, 0.0 }
 0x35f   : > { %v1531_v18 = vadd.f32 1e-05, %v1529_v56 }
 0x361   : > { %2447 = vrsqrt.f32 %v1531_v18 }
 0x36b   : > { %v2448_v58 = vpop.eup %2447 }
 0x36c   : > { %v1533_v53 = vmul.f32 %v2448_v58, %v1530_v29 }
 0x36e   : > { %v1538_v21 = vmul.f32 %v1537_v48, %v1533_v53 }
 0x370   : > { %v1543_v22 = vadd.f32 %v1542_v62, %v1538_v21 }
 0x372   : > { %1544 = vst [vmem:[%s267_s7] sm:$0xff] %v1543_v22 }
 0x373   : > { %2462 = shalt.err (!%p2459_p5)
}
 0x374   : > { %s2463_s16 = scalar_lea.hbm %s3177_s11, 128  ;;  %s2467_s25 = scalar_lea.hbm %s3229_s5, 384 }
 0x375   : > { %p2464_p6 = scmp.ne.s32.totalorder %s3177_s11, %s2463_s16  ;;  %p2468_p10 = scmp.lt.u32.totalorder %s3177_s11, %s3229_s5 }
 0x376   : > { %p2469_p11 = scmp.lt.u32.totalorder %s2467_s25, %s2463_s16  ;;  %p2471_p13 = scmp.lt.u32.totalorder %s2463_s16, %s3177_s11 }
 0x377   : > { %p2465_p7 = pnand %p2464_p6, %p2603_p4 }
 0x378   : > { %p2470_p12 = por %p2469_p11, %p2468_p10 }
 0x379   : > { %p2466_p9 = pneg %p2465_p7 }
 0x37a   : > { %p2472_p0 = por %p2471_p13, %p2470_p12 }
 0x37c   : > { %p2473_p1 = pnand %p2472_p0, %p2466_p9 }
 0x37e   : > { %2476 = shalt.err (!%p2473_p1)
}
 0x37f   : > { %2389 = dma.vmem_to_hbm [thread:$0]  (%p2603_p4), %s3179_s8, 128, %s3177_s11, %s1546_s12  }
 0x380 PF: > { %p2395_p2 = scmp.ge.s32.totalorder %s2527_s23, 2  ;;  %s1571_s7 = sand.u32 1, %s2507_s18  }
 0x381   : > { %s1572_s9 = scalar_lea.sflag [#allocation4], %s1571_s7 }
 0x382   : > { %p2392_p3 = pnand %p2395_p2, %p2610_p8 }
 0x384   : > { %2502 = dma.done.wait (!%p2392_p3), %s1572_s9, 128  }
 0x385   : > { %2504 = vsyncadd (!%p2392_p3), %s1572_s9, 4294967168  ;;  %s18_s23 = sadd.s32 1, %s2527_s23   ;;  %s3267_s18 = smov %s2511_s19 }
 0x386   : > { %p15_p5 = scmp.ge.s32.totalorder %s18_s23, 5   ;;  %s3268_s19 = smov %s2515_s20 }
 0x387   : > { %s3269_s20 = smov %s2616_s6  ;;  %s3270_s21 = smov %s2523_s22 }
 0x388   : > { %s3271_s22 = smov %s3273_s26  ;;  %17 = sbr.rel (!%p15_p5) target bundleno = 4 (0x4), region = 92 }
 0x38f   :  { %1577 = vsyncpa [#allocation4], 1 }
 0x390   :  { %1579 = vsyncpa [#allocation4 + $0x1], 1 }

</bundles_post_ra>
